<compile_context>
chip_gen: v5e
topology: v5e:2x2
jax: 0.10.0
libtpu: 0.0.40
codegen_flags: <defaults>
</compile_context>

<pallas_src>
import math

import jax
import jax.numpy as jnp
import numpy as np
from jax.experimental import pallas as pl
from jax.experimental.pallas import tpu as pltpu

FOUT = 8             # GraphConvolution out_features (in_features = 1)
HID = 8              # LSTM hidden size
NOUTPUT = 4          # final Linear out_features
N, T, M = 2, 4, 156  # batch, seq len, graph nodes (M*FOUT == 1248 == LSTM input_size)
D = M * FOUT         # 1248
H4 = 4 * HID         # 32


# --------------------------- Fused GCN + LSTM + FC kernel ---------------------------
def gcn_lstm_kernel(x_ref, wcomb_ref, sp_ref, out_ref):
    # x_ref     : (T*N, M)  bf16  time-major rows (row = t*N + n)
    # wcomb_ref : (M, 4H)   bf16  adj.T @ W_eff  (GCN graph-mix + input projection folded)
    # sp_ref    : (24, 4H)  f32   packed small params:
    #               row 0            -> b_eff (= b_ih + b_hh + GCN-bias fold)
    #               row 1  [:NOUT]   -> b_fc
    #               rows 8:16        -> W_hh^T  (H, 4H)
    #               rows 16:24 [:NOUT]-> W_fc^T (H, NOUT)
    # out_ref   : (N, NOUT) f32
    n = out_ref.shape[0]
    nout = out_ref.shape[1]
    hid = sp_ref.shape[1] // 4
    steps = x_ref.shape[0] // n

    sp = sp_ref[...]
    b_eff = sp[0:1, :]                       # (1, 4H)
    b_fc = sp[1:2, 0:nout]                   # (1, NOUT)
    whh = sp[8:8 + hid, :]                   # (H, 4H)
    wfc = sp[16:16 + hid, 0:nout]            # (H, NOUT)

    # Folded GCN graph-mix + input projection for ALL timesteps: one bf16 MXU call.
    gates_x = (jnp.dot(x_ref[...], wcomb_ref[...],
                       preferred_element_type=jnp.float32) + b_eff)      # (T*N, 4H) f32

    h = jnp.zeros((n, hid), jnp.float32)
    c = jnp.zeros((n, hid), jnp.float32)

    # Fully unrolled recurrence (T is small & static). Recurrent contribution via VPU
    # broadcast MACs so the serial chain never waits on an MXU result FIFO.
    for t in range(steps):
        rec = h[:, 0:1] * whh[0:1, :]
        for k in range(1, hid):
            rec = rec + h[:, k:k + 1] * whh[k:k + 1, :]
        gates = gates_x[t * n:(t + 1) * n, :] + rec                      # (N, 4H)
        sg = jax.nn.sigmoid(gates)   # one EUP pass over the full gate vector
        tg = jnp.tanh(gates)         # one EUP pass over the full gate vector
        i = sg[:, 0 * hid:1 * hid]
        f = sg[:, 1 * hid:2 * hid]
        g = tg[:, 2 * hid:3 * hid]
        o = sg[:, 3 * hid:4 * hid]
        c = f * c + i * g
        h = o * jnp.tanh(c)

    # Final FC (single tiny matmul, off the repeated serial chain).
    out_ref[...] = jnp.dot(h, wfc, preferred_element_type=jnp.float32) + b_fc


# --------------------- One-time parameter preprocessing (off hot path) ---------------------
def prepare_operands(params, adj):
    """Fold GCN + adjacency into the LSTM input projection and pack small params.

    Called ONCE per parameter set / adjacency; NOT part of the per-call forward.
    """
    hi = jax.lax.Precision.HIGHEST

    w = jnp.asarray(params["gcn_w"], jnp.float32).reshape(FOUT)
    b = jnp.asarray(params["gcn_b"], jnp.float32).reshape(FOUT)
    wih3 = jnp.asarray(params["w_ih"], jnp.float32).reshape(H4, M, FOUT)      # [j, m, f]

    # W_eff[m, j] = sum_f gcn_w[f] * W_ih[j, m*FOUT + f]
    w_eff = jnp.einsum("jmf,f->mj", wih3, w, precision=hi)                    # (M, 4H)
    # b_eff = b_ih + b_hh + sum_{m,f} gcn_b[f] * W_ih[:, m*FOUT + f]
    b_eff = (jnp.asarray(params["b_ih"], jnp.float32)
             + jnp.asarray(params["b_hh"], jnp.float32)
             + jnp.einsum("jmf,f->j", wih3, b, precision=hi))                 # (4H,)

    # Fold the adjacency as well: (x @ adjT) @ W_eff == x @ (adj.T @ W_eff).
    adjT = jnp.asarray(adj, jnp.float32).T
    w_comb = jnp.dot(adjT, w_eff, precision=hi)                               # (M, 4H)

    # Pack every remaining tiny f32 operand into ONE array (one DMA instead of four).
    sp = jnp.zeros((24, H4), jnp.float32)
    sp = sp.at[0, :].set(b_eff)
    sp = sp.at[1, :NOUTPUT].set(jnp.asarray(params["b_fc"], jnp.float32).reshape(NOUTPUT))
    sp = sp.at[8:16, :].set(jnp.asarray(params["w_hh"], jnp.float32).T)       # (H, 4H)
    sp = sp.at[16:24, :NOUTPUT].set(jnp.asarray(params["w_fc"], jnp.float32).T)  # (H, NOUT)

    return w_comb.astype(jnp.bfloat16), sp


# ----------------------------------- Hot-path forward -----------------------------------
@jax.jit
def gcn_lstm_forward(x, w_comb_bf16, small_params):
    n, t, m = x.shape
    # Time-major rows (row = t*N + n); bf16 MXU operand. Only relayout in the hot path.
    x_tm = jnp.transpose(x, (1, 0, 2)).reshape(t * n, m).astype(jnp.bfloat16)

    vmem = pl.BlockSpec(memory_space=pltpu.MemorySpace.VMEM)  # whole array, VMEM-resident,
    return pl.pallas_call(                                    # no pipelining (single grid point)
        gcn_lstm_kernel,
        out_shape=jax.ShapeDtypeStruct((n, NOUTPUT), jnp.float32),
        in_specs=[vmem, vmem, vmem],
        out_specs=vmem,
    )(x_tm, w_comb_bf16, small_params)


# ------------------------------ Pure-numpy reference ---------------------------------
def reference_forward(x, adj, params):
    x = np.asarray(x, np.float32)
    adj = np.asarray(adj, np.float32)
    p = {k: np.asarray(v, np.float32) for k, v in params.items()}
    Nloc, Tloc, Mloc = x.shape
    seq = []
    for t in range(Tloc):
        xt = x[:, t, :]                       # (N, M)
        xg = (adj @ xt.T).T                   # (N, M)   adjacency mix
        y = xg.reshape(Nloc * Mloc, 1) @ p["gcn_w"] + p["gcn_b"]  # GraphConvolution, in_feat=1
        seq.append(y.reshape(Nloc, Mloc * FOUT))
    seq = np.stack(seq, axis=1)               # (N, T, M*FOUT)
    h = np.zeros((Nloc, HID), np.float32)
    c = np.zeros((Nloc, HID), np.float32)
    sig = lambda z: 1.0 / (1.0 + np.exp(-z))
    for t in range(Tloc):
        gates = seq[:, t, :] @ p["w_ih"].T + h @ p["w_hh"].T + p["b_ih"] + p["b_hh"]
        i = sig(gates[:, 0 * HID:1 * HID])
        f = sig(gates[:, 1 * HID:2 * HID])
        g = np.tanh(gates[:, 2 * HID:3 * HID])
        o = sig(gates[:, 3 * HID:4 * HID])
        c = f * c + i * g
        h = o * np.tanh(c)
    return h @ p["w_fc"].T + p["b_fc"]


# ----------------------------------- main --------------------------------------
if __name__ == "__main__":
    key = jax.random.PRNGKey(0)
    ks = jax.random.split(key, 10)

    # Deterministic parameter init (mirrors the PyTorch init ranges).
    stdv_g = 1.0 / math.sqrt(FOUT)
    stdv_l = 1.0 / math.sqrt(HID)
    params = {
        "gcn_w": jax.random.uniform(ks[0], (1, FOUT), jnp.float32, -stdv_g, stdv_g),
        "gcn_b": jax.random.uniform(ks[1], (FOUT,), jnp.float32, -stdv_g, stdv_g),
        "w_ih": jax.random.uniform(ks[2], (4 * HID, D), jnp.float32, -stdv_l, stdv_l),
        "w_hh": jax.random.uniform(ks[3], (4 * HID, HID), jnp.float32, -stdv_l, stdv_l),
        "b_ih": jax.random.uniform(ks[4], (4 * HID,), jnp.float32, -stdv_l, stdv_l),
        "b_hh": jax.random.uniform(ks[5], (4 * HID,), jnp.float32, -stdv_l, stdv_l),
        "w_fc": jax.random.uniform(ks[6], (NOUTPUT, HID), jnp.float32, -stdv_l, stdv_l),
        "b_fc": jax.random.uniform(ks[7], (NOUTPUT,), jnp.float32, -stdv_l, stdv_l),
    }

    x = jax.random.normal(ks[8], (N, T, M), jnp.float32)
    adj = jax.random.uniform(ks[9], (M, M), jnp.float32, 0.0, 1.0) / M

    # One-time preprocessing (per parameter set / adjacency), hoisted off the hot path.
    w_comb_bf16, small = prepare_operands(params, adj)
    w_comb_bf16 = jax.block_until_ready(w_comb_bf16)
    small = jax.block_until_ready(small)

    out = gcn_lstm_forward(x, w_comb_bf16, small)
    out = jax.block_until_ready(out)

    ref = reference_forward(x, adj, params)
    assert out.shape == (N, NOUTPUT), out.shape
    # Tolerance accounts for bf16 MXU operands (explicitly requested by the perf review);
    # real bugs would be orders of magnitude larger.
    if not np.allclose(np.asarray(out), ref, rtol=1e-2, atol=2e-3):
        raise AssertionError(f"mismatch: max abs err = {np.abs(np.asarray(out) - ref).max()}")
    print("KERNEL_OK")
</pallas_src>

<mosaic_0001>
module attributes {stable_mosaic.version = 11 : i64} {
  func.func @gcn_lstm_kernel(%arg0: memref<8x156xbf16, #tpu.memory_space<vmem>>, %arg1: memref<156x32xbf16, #tpu.memory_space<vmem>>, %arg2: memref<24x32xf32, #tpu.memory_space<vmem>>, %arg3: memref<2x4xf32, #tpu.memory_space<vmem>>) attributes {dimension_semantics = [], scalar_prefetch = 0 : i64, scratch_operands = 0 : i64, tpu.core_type = #tpu.core_type<tc>} {
    %c0 = arith.constant 0 : index
    %c0_0 = arith.constant 0 : index
    %0 = vector.load %arg2[%c0, %c0_0] : memref<24x32xf32, #tpu.memory_space<vmem>>, vector<24x32xf32>
    %1 = vector.extract_strided_slice %0 {offsets = [0, 0], sizes = [1, 32], strides = [1, 1]} : vector<24x32xf32> to vector<1x32xf32>
    %2 = vector.extract_strided_slice %0 {offsets = [1, 0], sizes = [1, 4], strides = [1, 1]} : vector<24x32xf32> to vector<1x4xf32>
    %3 = vector.extract_strided_slice %0 {offsets = [8, 0], sizes = [8, 32], strides = [1, 1]} : vector<24x32xf32> to vector<8x32xf32>
    %4 = vector.extract_strided_slice %0 {offsets = [16, 0], sizes = [8, 4], strides = [1, 1]} : vector<24x32xf32> to vector<8x4xf32>
    %c0_1 = arith.constant 0 : index
    %c0_2 = arith.constant 0 : index
    %5 = vector.load %arg0[%c0_1, %c0_2] : memref<8x156xbf16, #tpu.memory_space<vmem>>, vector<8x156xbf16>
    %c0_3 = arith.constant 0 : index
    %c0_4 = arith.constant 0 : index
    %6 = vector.load %arg1[%c0_3, %c0_4] : memref<156x32xbf16, #tpu.memory_space<vmem>>, vector<156x32xbf16>
    %cst = arith.constant dense<0.000000e+00> : vector<8x32xf32>
    %7 = tpu.matmul %5, %6, %cst {dimension_numbers = #tpu.dot_dimension_numbers<[1], [0], [0], [1], [0, 0, 1, 1], [], []>} : vector<8x156xbf16>, vector<156x32xbf16>, vector<8x32xf32> -> vector<8x32xf32>
    %8 = vector.broadcast %1 : vector<1x32xf32> to vector<8x32xf32>
    %9 = arith.addf %7, %8 : vector<8x32xf32>
    %cst_5 = arith.constant 0.000000e+00 : f32
    %10 = vector.broadcast %cst_5 : f32 to vector<2x8xf32>
    %cst_6 = arith.constant 0.000000e+00 : f32
    %11 = vector.broadcast %cst_6 : f32 to vector<2x8xf32>
    %12 = vector.extract_strided_slice %10 {offsets = [0, 0], sizes = [2, 1], strides = [1, 1]} : vector<2x8xf32> to vector<2x1xf32>
    %13 = vector.extract_strided_slice %3 {offsets = [0, 0], sizes = [1, 32], strides = [1, 1]} : vector<8x32xf32> to vector<1x32xf32>
    %14 = vector.broadcast %12 : vector<2x1xf32> to vector<2x32xf32>
    %15 = vector.broadcast %13 : vector<1x32xf32> to vector<2x32xf32>
    %16 = arith.mulf %14, %15 : vector<2x32xf32>
    %17 = vector.extract_strided_slice %10 {offsets = [0, 1], sizes = [2, 1], strides = [1, 1]} : vector<2x8xf32> to vector<2x1xf32>
    %18 = vector.extract_strided_slice %3 {offsets = [1, 0], sizes = [1, 32], strides = [1, 1]} : vector<8x32xf32> to vector<1x32xf32>
    %19 = vector.broadcast %17 : vector<2x1xf32> to vector<2x32xf32>
    %20 = vector.broadcast %18 : vector<1x32xf32> to vector<2x32xf32>
    %21 = arith.mulf %19, %20 : vector<2x32xf32>
    %22 = arith.addf %16, %21 : vector<2x32xf32>
    %23 = vector.extract_strided_slice %10 {offsets = [0, 2], sizes = [2, 1], strides = [1, 1]} : vector<2x8xf32> to vector<2x1xf32>
    %24 = vector.extract_strided_slice %3 {offsets = [2, 0], sizes = [1, 32], strides = [1, 1]} : vector<8x32xf32> to vector<1x32xf32>
    %25 = vector.broadcast %23 : vector<2x1xf32> to vector<2x32xf32>
    %26 = vector.broadcast %24 : vector<1x32xf32> to vector<2x32xf32>
    %27 = arith.mulf %25, %26 : vector<2x32xf32>
    %28 = arith.addf %22, %27 : vector<2x32xf32>
    %29 = vector.extract_strided_slice %10 {offsets = [0, 3], sizes = [2, 1], strides = [1, 1]} : vector<2x8xf32> to vector<2x1xf32>
    %30 = vector.extract_strided_slice %3 {offsets = [3, 0], sizes = [1, 32], strides = [1, 1]} : vector<8x32xf32> to vector<1x32xf32>
    %31 = vector.broadcast %29 : vector<2x1xf32> to vector<2x32xf32>
    %32 = vector.broadcast %30 : vector<1x32xf32> to vector<2x32xf32>
    %33 = arith.mulf %31, %32 : vector<2x32xf32>
    %34 = arith.addf %28, %33 : vector<2x32xf32>
    %35 = vector.extract_strided_slice %10 {offsets = [0, 4], sizes = [2, 1], strides = [1, 1]} : vector<2x8xf32> to vector<2x1xf32>
    %36 = vector.extract_strided_slice %3 {offsets = [4, 0], sizes = [1, 32], strides = [1, 1]} : vector<8x32xf32> to vector<1x32xf32>
    %37 = vector.broadcast %35 : vector<2x1xf32> to vector<2x32xf32>
    %38 = vector.broadcast %36 : vector<1x32xf32> to vector<2x32xf32>
    %39 = arith.mulf %37, %38 : vector<2x32xf32>
    %40 = arith.addf %34, %39 : vector<2x32xf32>
    %41 = vector.extract_strided_slice %10 {offsets = [0, 5], sizes = [2, 1], strides = [1, 1]} : vector<2x8xf32> to vector<2x1xf32>
    %42 = vector.extract_strided_slice %3 {offsets = [5, 0], sizes = [1, 32], strides = [1, 1]} : vector<8x32xf32> to vector<1x32xf32>
    %43 = vector.broadcast %41 : vector<2x1xf32> to vector<2x32xf32>
    %44 = vector.broadcast %42 : vector<1x32xf32> to vector<2x32xf32>
    %45 = arith.mulf %43, %44 : vector<2x32xf32>
    %46 = arith.addf %40, %45 : vector<2x32xf32>
    %47 = vector.extract_strided_slice %10 {offsets = [0, 6], sizes = [2, 1], strides = [1, 1]} : vector<2x8xf32> to vector<2x1xf32>
    %48 = vector.extract_strided_slice %3 {offsets = [6, 0], sizes = [1, 32], strides = [1, 1]} : vector<8x32xf32> to vector<1x32xf32>
    %49 = vector.broadcast %47 : vector<2x1xf32> to vector<2x32xf32>
    %50 = vector.broadcast %48 : vector<1x32xf32> to vector<2x32xf32>
    %51 = arith.mulf %49, %50 : vector<2x32xf32>
    %52 = arith.addf %46, %51 : vector<2x32xf32>
    %53 = vector.extract_strided_slice %10 {offsets = [0, 7], sizes = [2, 1], strides = [1, 1]} : vector<2x8xf32> to vector<2x1xf32>
    %54 = vector.extract_strided_slice %3 {offsets = [7, 0], sizes = [1, 32], strides = [1, 1]} : vector<8x32xf32> to vector<1x32xf32>
    %55 = vector.broadcast %53 : vector<2x1xf32> to vector<2x32xf32>
    %56 = vector.broadcast %54 : vector<1x32xf32> to vector<2x32xf32>
    %57 = arith.mulf %55, %56 : vector<2x32xf32>
    %58 = arith.addf %52, %57 : vector<2x32xf32>
    %59 = vector.extract_strided_slice %9 {offsets = [0, 0], sizes = [2, 32], strides = [1, 1]} : vector<8x32xf32> to vector<2x32xf32>
    %60 = arith.addf %59, %58 : vector<2x32xf32>
    %61 = arith.negf %60 : vector<2x32xf32>
    %62 = math.exp %61 : vector<2x32xf32>
    %cst_7 = arith.constant 1.000000e+00 : f32
    %63 = vector.broadcast %cst_7 : f32 to vector<2x32xf32>
    %64 = arith.addf %63, %62 : vector<2x32xf32>
    %65 = arith.divf %63, %64 : vector<2x32xf32>
    %66 = math.tanh %60 : vector<2x32xf32>
    %67 = vector.extract_strided_slice %65 {offsets = [0, 0], sizes = [2, 8], strides = [1, 1]} : vector<2x32xf32> to vector<2x8xf32>
    %68 = vector.extract_strided_slice %65 {offsets = [0, 8], sizes = [2, 8], strides = [1, 1]} : vector<2x32xf32> to vector<2x8xf32>
    %69 = vector.extract_strided_slice %66 {offsets = [0, 16], sizes = [2, 8], strides = [1, 1]} : vector<2x32xf32> to vector<2x8xf32>
    %70 = vector.extract_strided_slice %65 {offsets = [0, 24], sizes = [2, 8], strides = [1, 1]} : vector<2x32xf32> to vector<2x8xf32>
    %71 = arith.mulf %68, %11 : vector<2x8xf32>
    %72 = arith.mulf %67, %69 : vector<2x8xf32>
    %73 = arith.addf %71, %72 : vector<2x8xf32>
    %74 = math.tanh %73 : vector<2x8xf32>
    %75 = arith.mulf %70, %74 : vector<2x8xf32>
    %76 = vector.extract_strided_slice %75 {offsets = [0, 0], sizes = [2, 1], strides = [1, 1]} : vector<2x8xf32> to vector<2x1xf32>
    %77 = vector.extract_strided_slice %3 {offsets = [0, 0], sizes = [1, 32], strides = [1, 1]} : vector<8x32xf32> to vector<1x32xf32>
    %78 = vector.broadcast %76 : vector<2x1xf32> to vector<2x32xf32>
    %79 = vector.broadcast %77 : vector<1x32xf32> to vector<2x32xf32>
    %80 = arith.mulf %78, %79 : vector<2x32xf32>
    %81 = vector.extract_strided_slice %75 {offsets = [0, 1], sizes = [2, 1], strides = [1, 1]} : vector<2x8xf32> to vector<2x1xf32>
    %82 = vector.extract_strided_slice %3 {offsets = [1, 0], sizes = [1, 32], strides = [1, 1]} : vector<8x32xf32> to vector<1x32xf32>
    %83 = vector.broadcast %81 : vector<2x1xf32> to vector<2x32xf32>
    %84 = vector.broadcast %82 : vector<1x32xf32> to vector<2x32xf32>
    %85 = arith.mulf %83, %84 : vector<2x32xf32>
    %86 = arith.addf %80, %85 : vector<2x32xf32>
    %87 = vector.extract_strided_slice %75 {offsets = [0, 2], sizes = [2, 1], strides = [1, 1]} : vector<2x8xf32> to vector<2x1xf32>
    %88 = vector.extract_strided_slice %3 {offsets = [2, 0], sizes = [1, 32], strides = [1, 1]} : vector<8x32xf32> to vector<1x32xf32>
    %89 = vector.broadcast %87 : vector<2x1xf32> to vector<2x32xf32>
    %90 = vector.broadcast %88 : vector<1x32xf32> to vector<2x32xf32>
    %91 = arith.mulf %89, %90 : vector<2x32xf32>
    %92 = arith.addf %86, %91 : vector<2x32xf32>
    %93 = vector.extract_strided_slice %75 {offsets = [0, 3], sizes = [2, 1], strides = [1, 1]} : vector<2x8xf32> to vector<2x1xf32>
    %94 = vector.extract_strided_slice %3 {offsets = [3, 0], sizes = [1, 32], strides = [1, 1]} : vector<8x32xf32> to vector<1x32xf32>
    %95 = vector.broadcast %93 : vector<2x1xf32> to vector<2x32xf32>
    %96 = vector.broadcast %94 : vector<1x32xf32> to vector<2x32xf32>
    %97 = arith.mulf %95, %96 : vector<2x32xf32>
    %98 = arith.addf %92, %97 : vector<2x32xf32>
    %99 = vector.extract_strided_slice %75 {offsets = [0, 4], sizes = [2, 1], strides = [1, 1]} : vector<2x8xf32> to vector<2x1xf32>
    %100 = vector.extract_strided_slice %3 {offsets = [4, 0], sizes = [1, 32], strides = [1, 1]} : vector<8x32xf32> to vector<1x32xf32>
    %101 = vector.broadcast %99 : vector<2x1xf32> to vector<2x32xf32>
    %102 = vector.broadcast %100 : vector<1x32xf32> to vector<2x32xf32>
    %103 = arith.mulf %101, %102 : vector<2x32xf32>
    %104 = arith.addf %98, %103 : vector<2x32xf32>
    %105 = vector.extract_strided_slice %75 {offsets = [0, 5], sizes = [2, 1], strides = [1, 1]} : vector<2x8xf32> to vector<2x1xf32>
    %106 = vector.extract_strided_slice %3 {offsets = [5, 0], sizes = [1, 32], strides = [1, 1]} : vector<8x32xf32> to vector<1x32xf32>
    %107 = vector.broadcast %105 : vector<2x1xf32> to vector<2x32xf32>
    %108 = vector.broadcast %106 : vector<1x32xf32> to vector<2x32xf32>
    %109 = arith.mulf %107, %108 : vector<2x32xf32>
    %110 = arith.addf %104, %109 : vector<2x32xf32>
    %111 = vector.extract_strided_slice %75 {offsets = [0, 6], sizes = [2, 1], strides = [1, 1]} : vector<2x8xf32> to vector<2x1xf32>
    %112 = vector.extract_strided_slice %3 {offsets = [6, 0], sizes = [1, 32], strides = [1, 1]} : vector<8x32xf32> to vector<1x32xf32>
    %113 = vector.broadcast %111 : vector<2x1xf32> to vector<2x32xf32>
    %114 = vector.broadcast %112 : vector<1x32xf32> to vector<2x32xf32>
    %115 = arith.mulf %113, %114 : vector<2x32xf32>
    %116 = arith.addf %110, %115 : vector<2x32xf32>
    %117 = vector.extract_strided_slice %75 {offsets = [0, 7], sizes = [2, 1], strides = [1, 1]} : vector<2x8xf32> to vector<2x1xf32>
    %118 = vector.extract_strided_slice %3 {offsets = [7, 0], sizes = [1, 32], strides = [1, 1]} : vector<8x32xf32> to vector<1x32xf32>
    %119 = vector.broadcast %117 : vector<2x1xf32> to vector<2x32xf32>
    %120 = vector.broadcast %118 : vector<1x32xf32> to vector<2x32xf32>
    %121 = arith.mulf %119, %120 : vector<2x32xf32>
    %122 = arith.addf %116, %121 : vector<2x32xf32>
    %123 = vector.extract_strided_slice %9 {offsets = [2, 0], sizes = [2, 32], strides = [1, 1]} : vector<8x32xf32> to vector<2x32xf32>
    %124 = arith.addf %123, %122 : vector<2x32xf32>
    %125 = arith.negf %124 : vector<2x32xf32>
    %126 = math.exp %125 : vector<2x32xf32>
    %cst_8 = arith.constant 1.000000e+00 : f32
    %127 = vector.broadcast %cst_8 : f32 to vector<2x32xf32>
    %128 = arith.addf %127, %126 : vector<2x32xf32>
    %129 = arith.divf %127, %128 : vector<2x32xf32>
    %130 = math.tanh %124 : vector<2x32xf32>
    %131 = vector.extract_strided_slice %129 {offsets = [0, 0], sizes = [2, 8], strides = [1, 1]} : vector<2x32xf32> to vector<2x8xf32>
    %132 = vector.extract_strided_slice %129 {offsets = [0, 8], sizes = [2, 8], strides = [1, 1]} : vector<2x32xf32> to vector<2x8xf32>
    %133 = vector.extract_strided_slice %130 {offsets = [0, 16], sizes = [2, 8], strides = [1, 1]} : vector<2x32xf32> to vector<2x8xf32>
    %134 = vector.extract_strided_slice %129 {offsets = [0, 24], sizes = [2, 8], strides = [1, 1]} : vector<2x32xf32> to vector<2x8xf32>
    %135 = arith.mulf %132, %73 : vector<2x8xf32>
    %136 = arith.mulf %131, %133 : vector<2x8xf32>
    %137 = arith.addf %135, %136 : vector<2x8xf32>
    %138 = math.tanh %137 : vector<2x8xf32>
    %139 = arith.mulf %134, %138 : vector<2x8xf32>
    %140 = vector.extract_strided_slice %139 {offsets = [0, 0], sizes = [2, 1], strides = [1, 1]} : vector<2x8xf32> to vector<2x1xf32>
    %141 = vector.extract_strided_slice %3 {offsets = [0, 0], sizes = [1, 32], strides = [1, 1]} : vector<8x32xf32> to vector<1x32xf32>
    %142 = vector.broadcast %140 : vector<2x1xf32> to vector<2x32xf32>
    %143 = vector.broadcast %141 : vector<1x32xf32> to vector<2x32xf32>
    %144 = arith.mulf %142, %143 : vector<2x32xf32>
    %145 = vector.extract_strided_slice %139 {offsets = [0, 1], sizes = [2, 1], strides = [1, 1]} : vector<2x8xf32> to vector<2x1xf32>
    %146 = vector.extract_strided_slice %3 {offsets = [1, 0], sizes = [1, 32], strides = [1, 1]} : vector<8x32xf32> to vector<1x32xf32>
    %147 = vector.broadcast %145 : vector<2x1xf32> to vector<2x32xf32>
    %148 = vector.broadcast %146 : vector<1x32xf32> to vector<2x32xf32>
    %149 = arith.mulf %147, %148 : vector<2x32xf32>
    %150 = arith.addf %144, %149 : vector<2x32xf32>
    %151 = vector.extract_strided_slice %139 {offsets = [0, 2], sizes = [2, 1], strides = [1, 1]} : vector<2x8xf32> to vector<2x1xf32>
    %152 = vector.extract_strided_slice %3 {offsets = [2, 0], sizes = [1, 32], strides = [1, 1]} : vector<8x32xf32> to vector<1x32xf32>
    %153 = vector.broadcast %151 : vector<2x1xf32> to vector<2x32xf32>
    %154 = vector.broadcast %152 : vector<1x32xf32> to vector<2x32xf32>
    %155 = arith.mulf %153, %154 : vector<2x32xf32>
    %156 = arith.addf %150, %155 : vector<2x32xf32>
    %157 = vector.extract_strided_slice %139 {offsets = [0, 3], sizes = [2, 1], strides = [1, 1]} : vector<2x8xf32> to vector<2x1xf32>
    %158 = vector.extract_strided_slice %3 {offsets = [3, 0], sizes = [1, 32], strides = [1, 1]} : vector<8x32xf32> to vector<1x32xf32>
    %159 = vector.broadcast %157 : vector<2x1xf32> to vector<2x32xf32>
    %160 = vector.broadcast %158 : vector<1x32xf32> to vector<2x32xf32>
    %161 = arith.mulf %159, %160 : vector<2x32xf32>
    %162 = arith.addf %156, %161 : vector<2x32xf32>
    %163 = vector.extract_strided_slice %139 {offsets = [0, 4], sizes = [2, 1], strides = [1, 1]} : vector<2x8xf32> to vector<2x1xf32>
    %164 = vector.extract_strided_slice %3 {offsets = [4, 0], sizes = [1, 32], strides = [1, 1]} : vector<8x32xf32> to vector<1x32xf32>
    %165 = vector.broadcast %163 : vector<2x1xf32> to vector<2x32xf32>
    %166 = vector.broadcast %164 : vector<1x32xf32> to vector<2x32xf32>
    %167 = arith.mulf %165, %166 : vector<2x32xf32>
    %168 = arith.addf %162, %167 : vector<2x32xf32>
    %169 = vector.extract_strided_slice %139 {offsets = [0, 5], sizes = [2, 1], strides = [1, 1]} : vector<2x8xf32> to vector<2x1xf32>
    %170 = vector.extract_strided_slice %3 {offsets = [5, 0], sizes = [1, 32], strides = [1, 1]} : vector<8x32xf32> to vector<1x32xf32>
    %171 = vector.broadcast %169 : vector<2x1xf32> to vector<2x32xf32>
    %172 = vector.broadcast %170 : vector<1x32xf32> to vector<2x32xf32>
    %173 = arith.mulf %171, %172 : vector<2x32xf32>
    %174 = arith.addf %168, %173 : vector<2x32xf32>
    %175 = vector.extract_strided_slice %139 {offsets = [0, 6], sizes = [2, 1], strides = [1, 1]} : vector<2x8xf32> to vector<2x1xf32>
    %176 = vector.extract_strided_slice %3 {offsets = [6, 0], sizes = [1, 32], strides = [1, 1]} : vector<8x32xf32> to vector<1x32xf32>
    %177 = vector.broadcast %175 : vector<2x1xf32> to vector<2x32xf32>
    %178 = vector.broadcast %176 : vector<1x32xf32> to vector<2x32xf32>
    %179 = arith.mulf %177, %178 : vector<2x32xf32>
    %180 = arith.addf %174, %179 : vector<2x32xf32>
    %181 = vector.extract_strided_slice %139 {offsets = [0, 7], sizes = [2, 1], strides = [1, 1]} : vector<2x8xf32> to vector<2x1xf32>
    %182 = vector.extract_strided_slice %3 {offsets = [7, 0], sizes = [1, 32], strides = [1, 1]} : vector<8x32xf32> to vector<1x32xf32>
    %183 = vector.broadcast %181 : vector<2x1xf32> to vector<2x32xf32>
    %184 = vector.broadcast %182 : vector<1x32xf32> to vector<2x32xf32>
    %185 = arith.mulf %183, %184 : vector<2x32xf32>
    %186 = arith.addf %180, %185 : vector<2x32xf32>
    %187 = vector.extract_strided_slice %9 {offsets = [4, 0], sizes = [2, 32], strides = [1, 1]} : vector<8x32xf32> to vector<2x32xf32>
    %188 = arith.addf %187, %186 : vector<2x32xf32>
    %189 = arith.negf %188 : vector<2x32xf32>
    %190 = math.exp %189 : vector<2x32xf32>
    %cst_9 = arith.constant 1.000000e+00 : f32
    %191 = vector.broadcast %cst_9 : f32 to vector<2x32xf32>
    %192 = arith.addf %191, %190 : vector<2x32xf32>
    %193 = arith.divf %191, %192 : vector<2x32xf32>
    %194 = math.tanh %188 : vector<2x32xf32>
    %195 = vector.extract_strided_slice %193 {offsets = [0, 0], sizes = [2, 8], strides = [1, 1]} : vector<2x32xf32> to vector<2x8xf32>
    %196 = vector.extract_strided_slice %193 {offsets = [0, 8], sizes = [2, 8], strides = [1, 1]} : vector<2x32xf32> to vector<2x8xf32>
    %197 = vector.extract_strided_slice %194 {offsets = [0, 16], sizes = [2, 8], strides = [1, 1]} : vector<2x32xf32> to vector<2x8xf32>
    %198 = vector.extract_strided_slice %193 {offsets = [0, 24], sizes = [2, 8], strides = [1, 1]} : vector<2x32xf32> to vector<2x8xf32>
    %199 = arith.mulf %196, %137 : vector<2x8xf32>
    %200 = arith.mulf %195, %197 : vector<2x8xf32>
    %201 = arith.addf %199, %200 : vector<2x8xf32>
    %202 = math.tanh %201 : vector<2x8xf32>
    %203 = arith.mulf %198, %202 : vector<2x8xf32>
    %204 = vector.extract_strided_slice %203 {offsets = [0, 0], sizes = [2, 1], strides = [1, 1]} : vector<2x8xf32> to vector<2x1xf32>
    %205 = vector.extract_strided_slice %3 {offsets = [0, 0], sizes = [1, 32], strides = [1, 1]} : vector<8x32xf32> to vector<1x32xf32>
    %206 = vector.broadcast %204 : vector<2x1xf32> to vector<2x32xf32>
    %207 = vector.broadcast %205 : vector<1x32xf32> to vector<2x32xf32>
    %208 = arith.mulf %206, %207 : vector<2x32xf32>
    %209 = vector.extract_strided_slice %203 {offsets = [0, 1], sizes = [2, 1], strides = [1, 1]} : vector<2x8xf32> to vector<2x1xf32>
    %210 = vector.extract_strided_slice %3 {offsets = [1, 0], sizes = [1, 32], strides = [1, 1]} : vector<8x32xf32> to vector<1x32xf32>
    %211 = vector.broadcast %209 : vector<2x1xf32> to vector<2x32xf32>
    %212 = vector.broadcast %210 : vector<1x32xf32> to vector<2x32xf32>
    %213 = arith.mulf %211, %212 : vector<2x32xf32>
    %214 = arith.addf %208, %213 : vector<2x32xf32>
    %215 = vector.extract_strided_slice %203 {offsets = [0, 2], sizes = [2, 1], strides = [1, 1]} : vector<2x8xf32> to vector<2x1xf32>
    %216 = vector.extract_strided_slice %3 {offsets = [2, 0], sizes = [1, 32], strides = [1, 1]} : vector<8x32xf32> to vector<1x32xf32>
    %217 = vector.broadcast %215 : vector<2x1xf32> to vector<2x32xf32>
    %218 = vector.broadcast %216 : vector<1x32xf32> to vector<2x32xf32>
    %219 = arith.mulf %217, %218 : vector<2x32xf32>
    %220 = arith.addf %214, %219 : vector<2x32xf32>
    %221 = vector.extract_strided_slice %203 {offsets = [0, 3], sizes = [2, 1], strides = [1, 1]} : vector<2x8xf32> to vector<2x1xf32>
    %222 = vector.extract_strided_slice %3 {offsets = [3, 0], sizes = [1, 32], strides = [1, 1]} : vector<8x32xf32> to vector<1x32xf32>
    %223 = vector.broadcast %221 : vector<2x1xf32> to vector<2x32xf32>
    %224 = vector.broadcast %222 : vector<1x32xf32> to vector<2x32xf32>
    %225 = arith.mulf %223, %224 : vector<2x32xf32>
    %226 = arith.addf %220, %225 : vector<2x32xf32>
    %227 = vector.extract_strided_slice %203 {offsets = [0, 4], sizes = [2, 1], strides = [1, 1]} : vector<2x8xf32> to vector<2x1xf32>
    %228 = vector.extract_strided_slice %3 {offsets = [4, 0], sizes = [1, 32], strides = [1, 1]} : vector<8x32xf32> to vector<1x32xf32>
    %229 = vector.broadcast %227 : vector<2x1xf32> to vector<2x32xf32>
    %230 = vector.broadcast %228 : vector<1x32xf32> to vector<2x32xf32>
    %231 = arith.mulf %229, %230 : vector<2x32xf32>
    %232 = arith.addf %226, %231 : vector<2x32xf32>
    %233 = vector.extract_strided_slice %203 {offsets = [0, 5], sizes = [2, 1], strides = [1, 1]} : vector<2x8xf32> to vector<2x1xf32>
    %234 = vector.extract_strided_slice %3 {offsets = [5, 0], sizes = [1, 32], strides = [1, 1]} : vector<8x32xf32> to vector<1x32xf32>
    %235 = vector.broadcast %233 : vector<2x1xf32> to vector<2x32xf32>
    %236 = vector.broadcast %234 : vector<1x32xf32> to vector<2x32xf32>
    %237 = arith.mulf %235, %236 : vector<2x32xf32>
    %238 = arith.addf %232, %237 : vector<2x32xf32>
    %239 = vector.extract_strided_slice %203 {offsets = [0, 6], sizes = [2, 1], strides = [1, 1]} : vector<2x8xf32> to vector<2x1xf32>
    %240 = vector.extract_strided_slice %3 {offsets = [6, 0], sizes = [1, 32], strides = [1, 1]} : vector<8x32xf32> to vector<1x32xf32>
    %241 = vector.broadcast %239 : vector<2x1xf32> to vector<2x32xf32>
    %242 = vector.broadcast %240 : vector<1x32xf32> to vector<2x32xf32>
    %243 = arith.mulf %241, %242 : vector<2x32xf32>
    %244 = arith.addf %238, %243 : vector<2x32xf32>
    %245 = vector.extract_strided_slice %203 {offsets = [0, 7], sizes = [2, 1], strides = [1, 1]} : vector<2x8xf32> to vector<2x1xf32>
    %246 = vector.extract_strided_slice %3 {offsets = [7, 0], sizes = [1, 32], strides = [1, 1]} : vector<8x32xf32> to vector<1x32xf32>
    %247 = vector.broadcast %245 : vector<2x1xf32> to vector<2x32xf32>
    %248 = vector.broadcast %246 : vector<1x32xf32> to vector<2x32xf32>
    %249 = arith.mulf %247, %248 : vector<2x32xf32>
    %250 = arith.addf %244, %249 : vector<2x32xf32>
    %251 = vector.extract_strided_slice %9 {offsets = [6, 0], sizes = [2, 32], strides = [1, 1]} : vector<8x32xf32> to vector<2x32xf32>
    %252 = arith.addf %251, %250 : vector<2x32xf32>
    %253 = arith.negf %252 : vector<2x32xf32>
    %254 = math.exp %253 : vector<2x32xf32>
    %cst_10 = arith.constant 1.000000e+00 : f32
    %255 = vector.broadcast %cst_10 : f32 to vector<2x32xf32>
    %256 = arith.addf %255, %254 : vector<2x32xf32>
    %257 = arith.divf %255, %256 : vector<2x32xf32>
    %258 = math.tanh %252 : vector<2x32xf32>
    %259 = vector.extract_strided_slice %257 {offsets = [0, 0], sizes = [2, 8], strides = [1, 1]} : vector<2x32xf32> to vector<2x8xf32>
    %260 = vector.extract_strided_slice %257 {offsets = [0, 8], sizes = [2, 8], strides = [1, 1]} : vector<2x32xf32> to vector<2x8xf32>
    %261 = vector.extract_strided_slice %258 {offsets = [0, 16], sizes = [2, 8], strides = [1, 1]} : vector<2x32xf32> to vector<2x8xf32>
    %262 = vector.extract_strided_slice %257 {offsets = [0, 24], sizes = [2, 8], strides = [1, 1]} : vector<2x32xf32> to vector<2x8xf32>
    %263 = arith.mulf %260, %201 : vector<2x8xf32>
    %264 = arith.mulf %259, %261 : vector<2x8xf32>
    %265 = arith.addf %263, %264 : vector<2x8xf32>
    %266 = math.tanh %265 : vector<2x8xf32>
    %267 = arith.mulf %262, %266 : vector<2x8xf32>
    %cst_11 = arith.constant dense<0.000000e+00> : vector<2x4xf32>
    %268 = tpu.matmul %267, %4, %cst_11 {dimension_numbers = #tpu.dot_dimension_numbers<[1], [0], [0], [1], [0, 0, 1, 1], [], []>} : vector<2x8xf32>, vector<8x4xf32>, vector<2x4xf32> -> vector<2x4xf32>
    %269 = vector.broadcast %2 : vector<1x4xf32> to vector<2x4xf32>
    %270 = arith.addf %268, %269 : vector<2x4xf32>
    %c0_12 = arith.constant 0 : index
    %c0_13 = arith.constant 0 : index
    %271 = vector.load %arg3[%c0_12, %c0_13] : memref<2x4xf32, #tpu.memory_space<vmem>>, vector<2x4xf32>
    tpu.vector_store %arg3[%c0_12, %c0_13], %270 {strides = array<i32>} : memref<2x4xf32, #tpu.memory_space<vmem>>, vector<2x4xf32>,
    return
  }
}

</mosaic_0001>

<bundles_post_ra>
// kernel: gcn_lstm_forward.1
= control target key start
LH: loop header
LB: loop body
LE: loop exit
PB: predicated region body
PF: predicated region fallthrough
CT: control target
= control target key end

     0   :  { %vm110_vm0 = vcmask 1045504   ;;  %s861_s0 = inlined_call_operand.vmem [shape: bf16[8,156], index: 0, kind: input, shape index: {}]   ;;  %s862_s1 = inlined_call_operand.vmem [shape: bf16[156,32], index: 1, kind: input, shape index: {}]   ;;  %s863_s2 = inlined_call_operand.vmem [shape: f32[24,32], index: 2, kind: input, shape index: {}]   ;;  %s864_s3 = inlined_call_operand.hbm [shape: f32[2,4], index: 3, kind: output, shape index: {}]  }
   0x1   :  { %v576_v0 = vld [vmem:[%s862_s1 + $0x38] sm:$0xff]  ;;  %v561_v1 = vld [vmem:[%s862_s1 + $0x48] sm:$0xf]  ;;  %v575_v2 = vld [vmem:[%s862_s1 + $0x30] sm:$0xff] }
   0x2   :  { %114 = vmatpush.bf16.msra.mxu0 %v576_v0  ;;  %v578_v3 = vld [vmem:[%s862_s1 + $0x48] sm:$0x30]  ;;  %v19_v5 = vld [vmem:[%s861_s0] sm:$0xff] }
   0x3   :  { %v562_v4 = vor.u32 %v578_v3, %v561_v1 }
   0x4   :  { %8 = vsyncpa [#allocation3], 0  ;;  %v43_v7 = vunpack.c.h.b16 %v19_v5  ;;  %v574_v8 = vld [vmem:[%s862_s1 + $0x28] sm:$0xff]  ;;  %v577_v9 = vld [vmem:[%s862_s1 + $0x40] sm:$0xff]  ;;  %vm106_vm1 = vcmask 228352   ;;  %v42_v15 = vunpack.c.l.b16 %v19_v5  ;;  %s674_s11 = smov 112  }
   0x5   :  { %v112_v6 = vsel %vm110_vm0, %v562_v4, 0  ;;  %v573_v11 = vld [vmem:[%s862_s1 + $0x20] sm:$0xff]  ;;  %v572_v12 = vld [vmem:[%s862_s1 + $0x18] sm:$0xff]  ;;  %v571_v13 = vld [vmem:[%s862_s1 + $0x10] sm:$0xff]  ;;  %s675_s12 = smov 8   ;;  %s676_s13 = smov 16  }
   0x6   :  { %115 = vmatpush.bf16.msra.mxu0 %v575_v2  ;;  %133 = vmatpush.bf16.msra.mxu1 %v112_v6  ;;  %v45_v10 = vpack.c.b16 %v43_v7, %v43_v7  ;;  %v570_v14 = vld [vmem:[%s862_s1 + $0x8] sm:$0xff]  ;;  %v569_v16 = vld [vmem:[%s862_s1] sm:$0xff]  ;;  %v44_v17 = vpack.c.b16 %v42_v15, %v42_v15  ;;  %v677_v7 = vmov 27   ;;  %v683_v15 = vmov 30   ;;  %s685_s16 = smov 104   ;;  %s686_s17 = smov [#allocation2]  }
   0x7   :  { %v17_v18 = vld [vmem:[%s863_s2 + $0x8] sm:$0xff]  ;;  %v772_v41 = vld [vmem:[%s863_s2] sm:$0xff]  ;;  %595 = vset.pattern.permute.xlu0 %v677_v7  ;;  %s512_s18 = sshll.u32 %s686_s17, 4  ;;  %s514_s21 = sshll.u32 %s864_s3, 4  ;;  %s513_s18 = int_to_ptr.vmem [resolvable:$true] %s512_s18  ;;  %s515_s21 = int_to_ptr.hbm [resolvable:$true] %s514_s21 }
   0x8   :  { %v746_v19 = vperm.slane %v17_v18, 0  ;;  %v748_v20 = vperm.slane %v17_v18, 1  ;;  %v752_v23 = vperm.slane %v17_v18, 2  ;;  %v755_v26 = vperm.slane %v17_v18, 3 }
   0x9   :  { %v758_v30 = vperm.slane %v17_v18, 4  ;;  %v761_v33 = vperm.slane %v17_v18, 5  ;;  %v764_v37 = vperm.slane %v17_v18, 6  ;;  %v767_v40 = vperm.slane %v17_v18, 7 }
   0xa   :  { %116 = vmatpush.bf16.msra.mxu0 %v574_v8  ;;  %134 = vmatpush.bf16.msra.mxu1 %v577_v9  ;;  %v141_v21 = vmul.f32 0.0, %v746_v19  ;;  %v143_v22 = vmul.f32 0.0, %v748_v20  ;;  %v146_v25 = vmul.f32 0.0, %v752_v23  ;;  %v149_v29 = vmul.f32 0.0, %v755_v26 }
   0xb   :  { %v152_v32 = vmul.f32 0.0, %v758_v30  ;;  %v155_v36 = vmul.f32 0.0, %v761_v33  ;;  %v158_v39 = vmul.f32 0.0, %v764_v37  ;;  %v40_v42 = vperm.slane %v772_v41, 0 }
   0xc   :  { %v144_v24 = vadd.f32 %v143_v22, %v141_v21  ;;  %v161_v44 = vmul.f32 0.0, %v767_v40  ;;  %v678_v8 = vmov 25   ;;  %v679_v9 = vmov 24  }
   0xd   :  { %563 = vmatmul.msk.bf16.vlgmr.msra.gmra.mxu1 %vm106_vm1, %v45_v10  ;;  %593 = vset.pattern.permute.xlu2 %v678_v8 }
   0xe   :  { %117 = vmatpush.bf16.msra.mxu0 %v573_v11  ;;  %v147_v28 = vadd.f32 %v146_v25, %v144_v24  ;;  %592 = vset.pattern.permute.xlu1 %v679_v9 }
  0x10   :  { %v150_v31 = vadd.f32 %v149_v29, %v147_v28 }
  0x12   :  { %118 = vmatpush.bf16.msra.mxu0 %v572_v12  ;;  %v153_v35 = vadd.f32 %v152_v32, %v150_v31  ;;  %v680_v12 = vmov 26  }
  0x14   :  { %v156_v38 = vadd.f32 %v155_v36, %v153_v35 }
  0x16   :  { %119 = vmatpush.bf16.msra.mxu0 %v571_v13  ;;  %v159_v43 = vadd.f32 %v158_v39, %v156_v38  ;;  %v681_v13 = vmov 28  }
  0x18   :  { %v162_v47 = vadd.f32 %v161_v44, %v159_v43 }
  0x1a   :  { %120 = vmatpush.bf16.msra.mxu0 %v570_v14  ;;  %v682_v14 = vmov 29  }
  0x1e   :  { %121 = vmatpush.bf16.msra.mxu0 %v569_v16  ;;  %v684_v16 = vmov 31  }
  0x21   :  { %122 = vmatmul.bf16.vlgmr.msra.gmra.mxu0 %v44_v17 }
  0x8a   :  { %v136_v27 = vpop.f32.mrf.mxu1 }
  0x92   :  { %v138_v34 = vpop.f32.mrf.mxu1 }
  0x9e   :  { %v123_v45 = vpop.f32.mrf.mxu0 }
  0x9f   :  { %v124_v46 = vadd.f32 %v123_v45, %v40_v42 }
  0xa1   :  { %v776_v48 = vadd.f32 %v136_v27, %v124_v46 }
  0xa3   :  { %v163_v49 = vadd.f32 %v162_v47, %v776_v48 }
  0xa5   :  { %616 = vtanh.f32 %v163_v49  ;;  %v564_v52 = vmul.f32 -1.442695, %v163_v49 }
  0xa6   :  { %v125_v50 = vpop.f32.mrf.mxu0 }
  0xa7   :  { %618 = vpow2.f32 %v564_v52 }
  0xab   :  { %v617_v51 = vpop.eup %616 }
  0xac   :  { %186 = vrot.lane.b32.xlu0 %v617_v51, %s674_s11 }
  0xad   :  { %v619_v53 = vpop.eup %618 }
  0xae   :  { %v167_v54 = vadd.f32 1.0, %v619_v53 }
  0xb0   :  { %620 = vrcp.f32 %v167_v54  ;;  %v179_v60 = vand.u32 2147483648, %v167_v54  ;;  %vm173_vm3 = vweird.f32 %v167_v54  ;;  %v177_v61 = vand.u32 2147483647, %v167_v54 }
  0xb2   :  { %v180_v63 = vor.u32 1.1754944e-38, %v179_v60  ;;  %vm178_vm5 = vcmp.eq.f32.partialorder %v177_v61, 8.507059e+37 }
  0xb6   :  { %v621_v55 = vpop.eup %620 }
  0xb7   :  { %v169_v56 = vmul.f32 %v621_v55, %v167_v54  ;;  %vm174_vm2 = vweird.f32 %v621_v55 }
  0xb8   :  { %vm175_vm4 = vmor %vm173_vm3, %vm174_vm2  ;;  %vm482_vm2 = vcmask 64512   ;;  %vm505_vm3 = vcmask 25600  }
  0xb9   :  { %v170_v57 = vsub.f32 1.0, %v169_v56 }
  0xbb   :  { %v171_v58 = vmul.f32 %v621_v55, %v170_v57 }
  0xbd   :  { %v172_v59 = vadd.f32 %v621_v55, %v171_v58 }
  0xbf   :  { %v176_v62 = vsel %vm175_vm4, %v621_v55, %v172_v59 }
  0xc0   :  { %v181_v1 = vsel %vm178_vm5, %v180_v63, %v176_v62 }
  0xc1   :  { %v184_v3 = vmul.f32 0.0, %v181_v1 }
 0x11e   :  { %v187_v0 = vpop.permute.xlu0 %186 }
 0x11f   :  { %v189_v2 = vmul.f32 %v187_v0, %v181_v1 }
 0x121   :  { %191 = vrot.lane.b32.xlu0 %v189_v2, %s675_s12 }
 0x193   :  { %v192_v4 = vpop.permute.xlu0 %191 }
 0x194   :  { %v781_v5 = vadd.f32 %v192_v4, %v184_v3 }
 0x196   :  { %622 = vtanh.f32 %v781_v5  ;;  %v274_v4 = vrot.slane %v781_v5, 6 }
 0x19c   :  { %v623_v6 = vpop.eup %622 }
 0x19d   :  { %197 = vrot.lane.b32.xlu1 %v623_v6, %s676_s13 }
 0x20f   :  { %v198_v10 = vpop.permute.xlu1 %197 }
 0x210   :  { %v200_v11 = vmul.f32 %v198_v10, %v181_v1 }
 0x212   :  { %220 = vperm.xlu0 %595, %v200_v11   ;;  %208 = vperm.xlu2 %593, %v200_v11  }
 0x213   :  { %203 = vperm.xlu1 %592, %v200_v11  }
 0x21a   :  { %594 = vset.pattern.permute.xlu2 %v680_v12  ;;  %600 = vset.pattern.permute.xlu0 %v679_v9 }
 0x21b   :  { %596 = vset.pattern.permute.xlu1 %v681_v13  ;;  %214 = vperm.xlu2 %594, %v200_v11  }
 0x21c   :  { %226 = vperm.xlu1 %596, %v200_v11  }
 0x223   :  { %597 = vset.pattern.permute.xlu2 %v682_v14 }
 0x224   :  { %598 = vset.pattern.permute.xlu1 %v683_v15  ;;  %232 = vperm.xlu2 %597, %v200_v11  }
 0x225   :  { %238 = vperm.xlu1 %598, %v200_v11  }
 0x22c   :  { %599 = vset.pattern.permute.xlu2 %v684_v16 }
 0x22d   :  { %244 = vperm.xlu2 %599, %v200_v11   ;;  %601 = vset.pattern.permute.xlu1 %v678_v8 }
 0x235   :  { %602 = vset.pattern.permute.xlu2 %v680_v12 }
 0x26c   :  { %v209_v17 = vpop.permute.xlu2 %208 }
 0x26d   :  { %v211_v24 = vmul.f32 %v209_v17, %v748_v20 }
 0x275   :  { %v215_v18 = vpop.permute.xlu2 %214 }
 0x276   :  { %v217_v27 = vmul.f32 %v215_v18, %v752_v23 }
 0x27e   :  { %v233_v28 = vpop.permute.xlu2 %232 }
 0x27f   :  { %v235_v39 = vmul.f32 %v233_v28, %v761_v33 }
 0x284   :  { %v221_v29 = vpop.permute.xlu0 %220 }
 0x285   :  { %v204_v21 = vpop.permute.xlu1 %203  ;;  %v223_v34 = vmul.f32 %v221_v29, %v755_v26 }
 0x286   :  { %v206_v22 = vmul.f32 %v204_v21, %v746_v19 }
 0x287   :  { %v245_v42 = vpop.permute.xlu2 %244 }
 0x288   :  { %v212_v25 = vadd.f32 %v211_v24, %v206_v22  ;;  %v247_v46 = vmul.f32 %v245_v42, %v767_v40 }
 0x28a   :  { %v218_v31 = vadd.f32 %v217_v27, %v212_v25 }
 0x28c   :  { %v224_v36 = vadd.f32 %v223_v34, %v218_v31 }
 0x28e   :  { %v227_v32 = vpop.permute.xlu1 %226 }
 0x28f   :  { %v229_v35 = vmul.f32 %v227_v32, %v758_v30 }
 0x291   :  { %v230_v38 = vadd.f32 %v229_v35, %v224_v36 }
 0x293   :  { %v236_v44 = vadd.f32 %v235_v39, %v230_v38 }
 0x297   :  { %v239_v43 = vpop.permute.xlu1 %238 }
 0x298   :  { %v241_v45 = vmul.f32 %v239_v43, %v764_v37 }
 0x29a   :  { %v242_v47 = vadd.f32 %v241_v45, %v236_v44 }
 0x29c   :  { %v248_v49 = vadd.f32 %v247_v46, %v242_v47 }
 0x29e   :  { %v250_v50 = vrot.slane %v248_v49, 6 }
 0x2a0   :  { %v252_v51 = vadd.f32 %v250_v50, %v776_v48 }
 0x2a2   :  { %624 = vtanh.f32 %v252_v51  ;;  %v565_v53 = vmul.f32 -1.442695, %v252_v51 }
 0x2a4   :  { %626 = vpow2.f32 %v565_v53 }
 0x2a8   :  { %v625_v52 = vpop.eup %624 }
 0x2a9   :  { %278 = vrot.lane.b32.xlu0 %v625_v52, %s674_s11 }
 0x2aa   :  { %v627_v54 = vpop.eup %626 }
 0x2ab   :  { %v256_v55 = vadd.f32 1.0, %v627_v54 }
 0x2ad   :  { %628 = vrcp.f32 %v256_v55  ;;  %v268_v61 = vand.u32 2147483648, %v256_v55  ;;  %vm262_vm7 = vweird.f32 %v256_v55  ;;  %v266_v62 = vand.u32 2147483647, %v256_v55 }
 0x2af   :  { %v269_v0 = vor.u32 1.1754944e-38, %v268_v61  ;;  %vm267_vm9 = vcmp.eq.f32.partialorder %v266_v62, 8.507059e+37 }
 0x2b3   :  { %v629_v56 = vpop.eup %628 }
 0x2b4   :  { %v258_v57 = vmul.f32 %v629_v56, %v256_v55  ;;  %vm263_vm6 = vweird.f32 %v629_v56 }
 0x2b5   :  { %vm264_vm8 = vmor %vm262_vm7, %vm263_vm6 }
 0x2b6   :  { %v259_v58 = vsub.f32 1.0, %v258_v57 }
 0x2b8   :  { %v260_v59 = vmul.f32 %v629_v56, %v259_v58 }
 0x2ba   :  { %v261_v60 = vadd.f32 %v629_v56, %v260_v59 }
 0x2bc   :  { %v265_v63 = vsel %vm264_vm8, %v629_v56, %v261_v60 }
 0x2bd   :  { %v270_v2 = vsel %vm267_vm9, %v269_v0, %v265_v63 }
 0x2be   :  { %v276_v6 = vmul.f32 %v274_v4, %v270_v2 }
 0x31b   :  { %v279_v1 = vpop.permute.xlu0 %278 }
 0x31c   :  { %v281_v3 = vmul.f32 %v279_v1, %v270_v2 }
 0x31e   :  { %283 = vrot.lane.b32.xlu1 %v281_v3, %s675_s12 }
 0x390   :  { %v284_v10 = vpop.permute.xlu1 %283 }
 0x391   :  { %v808_v11 = vadd.f32 %v284_v10, %v276_v6 }
 0x393   :  { %630 = vtanh.f32 %v808_v11  ;;  %v366_v3 = vrot.slane %v808_v11, 6 }
 0x399   :  { %v631_v17 = vpop.eup %630 }
 0x39a   :  { %289 = vrot.lane.b32.xlu2 %v631_v17, %s676_s13 }
 0x3f4   :  { %v290_v18 = vpop.permute.xlu2 %289 }
 0x3f5   :  { %v292_v21 = vmul.f32 %v290_v18, %v270_v2 }
 0x3f7   :  { %306 = vperm.xlu2 %602, %v292_v21   ;;  %300 = vperm.xlu1 %601, %v292_v21  }
 0x3f8   :  { %295 = vperm.xlu0 %600, %v292_v21  }
 0x3ff   :  { %604 = vset.pattern.permute.xlu2 %v681_v13  ;;  %603 = vset.pattern.permute.xlu1 %v677_v7 }
 0x400   :  { %605 = vset.pattern.permute.xlu0 %v682_v14  ;;  %318 = vperm.xlu2 %604, %v292_v21  }
 0x401   :  { %312 = vperm.xlu1 %603, %v292_v21   ;;  %324 = vperm.xlu0 %605, %v292_v21  }
 0x408   :  { %607 = vset.pattern.permute.xlu2 %v684_v16 }
 0x409   :  { %606 = vset.pattern.permute.xlu1 %v683_v15  ;;  %336 = vperm.xlu2 %607, %v292_v21  }
 0x40a   :  { %330 = vperm.xlu1 %606, %v292_v21   ;;  %610 = vset.pattern.permute.xlu0 %v680_v12 }
 0x411   :  { %609 = vset.pattern.permute.xlu2 %v678_v8 }
 0x412   :  { %608 = vset.pattern.permute.xlu1 %v679_v9 }
 0x451   :  { %v307_v5 = vpop.permute.xlu2 %306 }
 0x452   :  { %v309_v29 = vmul.f32 %v307_v5, %v752_v23 }
 0x45a   :  { %v319_v31 = vpop.permute.xlu2 %318 }
 0x45b   :  { %v321_v8 = vmul.f32 %v319_v31, %v758_v30 }
 0x463   :  { %v337_v39 = vpop.permute.xlu2 %336 }
 0x464   :  { %v339_v45 = vmul.f32 %v337_v39, %v767_v40 }
 0x469   :  { %v301_v22 = vpop.permute.xlu1 %300 }
 0x46a   :  { %v296_v24 = vpop.permute.xlu0 %295  ;;  %v303_v25 = vmul.f32 %v301_v22, %v748_v20 }
 0x46b   :  { %v298_v27 = vmul.f32 %v296_v24, %v746_v19 }
 0x46d   :  { %v304_v28 = vadd.f32 %v303_v25, %v298_v27 }
 0x46f   :  { %v310_v34 = vadd.f32 %v309_v29, %v304_v28 }
 0x473   :  { %v313_v32 = vpop.permute.xlu1 %312  ;;  %v325_v36 = vpop.permute.xlu0 %324 }
 0x474   :  { %v315_v35 = vmul.f32 %v313_v32, %v755_v26  ;;  %v327_v38 = vmul.f32 %v325_v36, %v761_v33 }
 0x476   :  { %v316_v12 = vadd.f32 %v315_v35, %v310_v34 }
 0x478   :  { %v322_v9 = vadd.f32 %v321_v8, %v316_v12 }
 0x47a   :  { %v328_v43 = vadd.f32 %v327_v38, %v322_v9 }
 0x47c   :  { %v331_v42 = vpop.permute.xlu1 %330 }
 0x47d   :  { %v333_v44 = vmul.f32 %v331_v42, %v764_v37 }
 0x47f   :  { %v334_v46 = vadd.f32 %v333_v44, %v328_v43 }
 0x481   :  { %v340_v47 = vadd.f32 %v339_v45, %v334_v46 }
 0x483   :  { %v342_v49 = vrot.slane %v340_v47, 6 }
 0x485   :  { %v344_v50 = vadd.f32 %v342_v49, %v776_v48 }
 0x487   :  { %632 = vtanh.f32 %v344_v50  ;;  %v566_v52 = vmul.f32 -1.442695, %v344_v50 }
 0x489   :  { %634 = vpow2.f32 %v566_v52 }
 0x48d   :  { %v633_v51 = vpop.eup %632 }
 0x48e   :  { %370 = vrot.lane.b32.xlu1 %v633_v51, %s674_s11 }
 0x48f   :  { %v635_v53 = vpop.eup %634 }
 0x490   :  { %v348_v54 = vadd.f32 1.0, %v635_v53 }
 0x492   :  { %636 = vrcp.f32 %v348_v54  ;;  %v360_v60 = vand.u32 2147483648, %v348_v54  ;;  %vm354_vm11 = vweird.f32 %v348_v54  ;;  %v358_v61 = vand.u32 2147483647, %v348_v54 }
 0x494   :  { %v361_v63 = vor.u32 1.1754944e-38, %v360_v60  ;;  %vm359_vm13 = vcmp.eq.f32.partialorder %v358_v61, 8.507059e+37 }
 0x498   :  { %v637_v55 = vpop.eup %636 }
 0x499   :  { %v350_v56 = vmul.f32 %v637_v55, %v348_v54  ;;  %vm355_vm10 = vweird.f32 %v637_v55 }
 0x49a   :  { %vm356_vm12 = vmor %vm354_vm11, %vm355_vm10 }
 0x49b   :  { %v351_v57 = vsub.f32 1.0, %v350_v56 }
 0x49d   :  { %v352_v58 = vmul.f32 %v637_v55, %v351_v57  ;;  %v18_v57 = vld [vmem:[%s863_s2 + $0x10] sm:$0xff] }
 0x49e   :  { %500 = vmatpush.msra.mxu2 %v18_v57 }
 0x49f   :  { %v353_v59 = vadd.f32 %v637_v55, %v352_v58 }
 0x4a1   :  { %v357_v62 = vsel %vm356_vm12, %v637_v55, %v353_v59 }
 0x4a2   :  { %v362_v1 = vsel %vm359_vm13, %v361_v63, %v357_v62  ;;  %v477_v62 = vperm.slane %v772_v41, 1 }
 0x4a3   :  { %v368_v4 = vmul.f32 %v366_v3, %v362_v1 }
 0x500   :  { %v371_v0 = vpop.permute.xlu1 %370 }
 0x501   :  { %v373_v2 = vmul.f32 %v371_v0, %v362_v1 }
 0x503   :  { %375 = vrot.lane.b32.xlu2 %v373_v2, %s675_s12 }
 0x55d   :  { %v376_v6 = vpop.permute.xlu2 %375 }
 0x55e   :  { %v832_v10 = vadd.f32 %v376_v6, %v368_v4 }
 0x560   :  { %638 = vtanh.f32 %v832_v10  ;;  %v458_v52 = vrot.slane %v832_v10, 6 }
 0x566   :  { %v639_v17 = vpop.eup %638 }
 0x567   :  { %381 = vrot.lane.b32.xlu0 %v639_v17, %s676_s13 }
 0x5d9   :  { %v382_v18 = vpop.permute.xlu0 %381 }
 0x5da   :  { %v384_v21 = vmul.f32 %v382_v18, %v362_v1 }
 0x5dc   :  { %398 = vperm.xlu0 %610, %v384_v21   ;;  %392 = vperm.xlu2 %609, %v384_v21  }
 0x5dd   :  { %387 = vperm.xlu1 %608, %v384_v21  }
 0x5e4   :  { %615 = vset.pattern.permute.xlu0 %v684_v16  ;;  %612 = vset.pattern.permute.xlu2 %v681_v13 }
 0x5e5   :  { %611 = vset.pattern.permute.xlu1 %v677_v7  ;;  %428 = vperm.xlu0 %615, %v384_v21  }
 0x5e6   :  { %410 = vperm.xlu2 %612, %v384_v21   ;;  %404 = vperm.xlu1 %611, %v384_v21  }
 0x5ee   :  { %614 = vset.pattern.permute.xlu2 %v683_v15  ;;  %613 = vset.pattern.permute.xlu1 %v682_v14 }
 0x5ef   :  { %422 = vperm.xlu2 %614, %v384_v21   ;;  %416 = vperm.xlu1 %613, %v384_v21  }
 0x636   :  { %v393_v11 = vpop.permute.xlu2 %392 }
 0x637   :  { %v395_v24 = vmul.f32 %v393_v11, %v748_v20 }
 0x640   :  { %v411_v16 = vpop.permute.xlu2 %410 }
 0x641   :  { %v413_v14 = vmul.f32 %v411_v16, %v758_v30 }
 0x649   :  { %v423_v31 = vpop.permute.xlu2 %422 }
 0x64a   :  { %v425_v20 = vmul.f32 %v423_v31, %v764_v37 }
 0x64e   :  { %v399_v25 = vpop.permute.xlu0 %398 }
 0x64f   :  { %v388_v5 = vpop.permute.xlu1 %387  ;;  %v401_v7 = vmul.f32 %v399_v25, %v752_v23 }
 0x650   :  { %v390_v22 = vmul.f32 %v388_v5, %v746_v19 }
 0x652   :  { %v396_v13 = vadd.f32 %v395_v24, %v390_v22 }
 0x654   :  { %v402_v29 = vadd.f32 %v401_v7, %v396_v13 }
 0x657   :  { %v429_v19 = vpop.permute.xlu0 %428 }
 0x658   :  { %v405_v27 = vpop.permute.xlu1 %404  ;;  %v431_v8 = vmul.f32 %v429_v19, %v767_v40 }
 0x659   :  { %v407_v28 = vmul.f32 %v405_v27, %v755_v26 }
 0x65b   :  { %v408_v15 = vadd.f32 %v407_v28, %v402_v29 }
 0x65d   :  { %v414_v34 = vadd.f32 %v413_v14, %v408_v15 }
 0x661   :  { %v417_v32 = vpop.permute.xlu1 %416 }
 0x662   :  { %v419_v35 = vmul.f32 %v417_v32, %v761_v33 }
 0x664   :  { %v420_v12 = vadd.f32 %v419_v35, %v414_v34 }
 0x666   :  { %v426_v36 = vadd.f32 %v425_v20, %v420_v12 }
 0x668   :  { %v432_v9 = vadd.f32 %v431_v8, %v426_v36 }
 0x66a   :  { %v434_v23 = vrot.slane %v432_v9, 6 }
 0x66c   :  { %v436_v26 = vadd.f32 %v434_v23, %v776_v48 }
 0x66e   :  { %640 = vtanh.f32 %v436_v26  ;;  %v567_v30 = vmul.f32 -1.442695, %v436_v26 }
 0x670   :  { %642 = vpow2.f32 %v567_v30 }
 0x674   :  { %v641_v38 = vpop.eup %640 }
 0x675   :  { %462 = vrot.lane.b32.xlu1 %v641_v38, %s674_s11 }
 0x676   :  { %v643_v39 = vpop.eup %642 }
 0x677   :  { %v440_v42 = vadd.f32 1.0, %v643_v39 }
 0x679   :  { %644 = vrcp.f32 %v440_v42  ;;  %v452_v40 = vand.u32 2147483648, %v440_v42  ;;  %vm446_vm15 = vweird.f32 %v440_v42  ;;  %v450_v46 = vand.u32 2147483647, %v440_v42 }
 0x67b   :  { %v453_v47 = vor.u32 1.1754944e-38, %v452_v40  ;;  %vm451_vm1 = vcmp.eq.f32.partialorder %v450_v46, 8.507059e+37 }
 0x67f   :  { %v645_v33 = vpop.eup %644 }
 0x680   :  { %v442_v43 = vmul.f32 %v645_v33, %v440_v42  ;;  %vm447_vm14 = vweird.f32 %v645_v33 }
 0x681   :  { %vm448_vm0 = vmor %vm446_vm15, %vm447_vm14 }
 0x682   :  { %v443_v37 = vsub.f32 1.0, %v442_v43 }
 0x684   :  { %v444_v44 = vmul.f32 %v645_v33, %v443_v37 }
 0x686   :  { %v445_v45 = vadd.f32 %v645_v33, %v444_v44 }
 0x688   :  { %v449_v48 = vsel %vm448_vm0, %v645_v33, %v445_v45 }
 0x689   :  { %v454_v50 = vsel %vm451_vm1, %v453_v47, %v449_v48 }
 0x68a   :  { %v460_v53 = vmul.f32 %v458_v52, %v454_v50 }
 0x6e7   :  { %v463_v49 = vpop.permute.xlu1 %462 }
 0x6e8   :  { %v465_v51 = vmul.f32 %v463_v49, %v454_v50 }
 0x6ea   :  { %467 = vrot.lane.b32.xlu2 %v465_v51, %s675_s12 }
 0x744   :  { %v468_v54 = vpop.permute.xlu2 %467 }
 0x745   :  { %v470_v55 = vadd.f32 %v468_v54, %v460_v53 }
 0x747   :  { %646 = vtanh.f32 %v470_v55 }
 0x74d   :  { %v647_v56 = vpop.eup %646 }
 0x74e   :  { %473 = vrot.lane.b32.xlu1 %v647_v56, %s676_s13 }
 0x7c0   :  { %v474_v58 = vpop.permute.xlu1 %473 }
 0x7c1   :  { %v476_v59 = vmul.f32 %v474_v58, %v454_v50 }
 0x7c3   :  { %v479_v60 = vrot.slane %v476_v59, 6 }
 0x7c5   :  { %480 = vrot.lane.b32.xlu2 %v479_v60, %s685_s16 }
 0x81f   :  { %v481_v61 = vpop.permute.xlu2 %480 }
 0x820   :  { %568 = vmatmul.msk.f32.vlgmr.msra.gmra.mxu2 %vm482_vm2, %v481_v61 }
 0x8a3   :  { %v502_v63 = vpop.f32.mrf.mxu2 }
 0x8a4   :  { %v503_v0 = vadd.f32 %v502_v63, %v477_v62 }
 0x8a6   :  { %506 = vst.msk [vmem:[#allocation2] sm:$0x3] %vm505_vm3, %v503_v0 }
 0x8a7   :  { %517 = dma.vmem_to_hbm [thread:$0]  %s513_s18, 32, %s515_s21, [#allocation3]  }
 0x8a8   :  { %672 = dma.done.wait [#allocation3], 32  }
 0x8a9   :  { %673 = vsyncadd [#allocation3], 4294967264 }
 0x8aa   :  { %522 = vsyncpa [#allocation3], 1 }

</bundles_post_ra>
